<compile_context>
chip_gen: v7x
topology: tpu7x:2x2x1
jax: 0.10.0
libtpu: 0.0.40
codegen_flags: <defaults>
</compile_context>

<pallas_src>
import jax
import jax.numpy as jnp
from jax.experimental import pallas as pl
from jax.experimental.pallas import tpu as pltpu


# ---------------------------------------------------------------------------
# Helpers
# ---------------------------------------------------------------------------
def _round_up(x, m):
    return (x + m - 1) // m * m


_SINGLE_BUFFER_OK = None


def _single_buffer_resident_supported():
    """One-time probe: does this jax/Mosaic build accept
    pipeline_mode=pl.Buffered(1) on a pallas_call BlockSpec?  Falls back to the
    default double-buffered resident specs if not."""
    global _SINGLE_BUFFER_OK
    if _SINGLE_BUFFER_OK is not None:
        return _SINGLE_BUFFER_OK
    try:
        def k(x_ref, o_ref):
            o_ref[...] = x_ref[...] + 1.0

        x = jnp.zeros((8, 128), jnp.float32)
        out = pl.pallas_call(
            k,
            out_shape=jax.ShapeDtypeStruct((8, 128), jnp.float32),
            grid=(2,),
            in_specs=[pl.BlockSpec((8, 128), lambda i: (0, 0),
                                   pipeline_mode=pl.Buffered(1))],
            out_specs=pl.BlockSpec((8, 128), lambda i: (0, 0)),
        )(x)
        jax.block_until_ready(out)
        _SINGLE_BUFFER_OK = True
    except Exception:
        _SINGLE_BUFFER_OK = False
    return _SINGLE_BUFFER_OK


def _choose_tile_b(B, min_mult):
    """Batch tile: big enough to amortize the ~0.35us/step grid overhead,
    >= 2 grid steps whenever the batch allows (2 TensorCores on v7x), and
    bounded batch-padding waste."""
    if B < 512:
        return _round_up(max(B, 1), min_mult)
    best = None
    for t in (1024, 896, 768, 640, 512, 448, 384, 320, 256):
        b_pad = _round_up(B, t)
        nb = b_pad // t
        waste = (b_pad - B) / B
        if nb >= 2 and waste <= 0.125:
            return t
        cand = (waste, 0 if nb >= 2 else 1, -t)
        if best is None or cand < best[:3]:
            best = cand + (t,)
    return best[3]


# ---------------------------------------------------------------------------
# Kernels
# ---------------------------------------------------------------------------
def _forward_body(x_ref, w0_ref, b0_ref, w1_ref, b1_ref, w2_ref, b2_ref):
    # In-kernel cast of the streamed f32 activations to the compute dtype
    # (no-op on the f32 path); f32 accumulation throughout.
    x = x_ref[...].astype(w0_ref.dtype)

    # pretrained_model: Linear + ReLU (backbone embeddings)
    h = jnp.dot(x, w0_ref[...], preferred_element_type=jnp.float32)
    h = jnp.maximum(h + b0_ref[...], 0.0)

    # additional_layers: Linear + ReLU (fine-tune embeddings)
    emb = jnp.dot(h.astype(w1_ref.dtype), w1_ref[...],
                  preferred_element_type=jnp.float32)
    emb = jnp.maximum(emb + b1_ref[...], 0.0)

    # final_layer: Linear (no activation)
    out = jnp.dot(emb.astype(w2_ref.dtype), w2_ref[...],
                  preferred_element_type=jnp.float32)
    return out + b2_ref[...], emb


def _finetune_kernel(x_ref, w0_ref, b0_ref, w1_ref, b1_ref, w2_ref, b2_ref,
                     out_ref):
    out, _ = _forward_body(x_ref, w0_ref, b0_ref, w1_ref, b1_ref, w2_ref, b2_ref)
    out_ref[...] = out.astype(out_ref.dtype)


def _finetune_kernel_with_emb(x_ref, w0_ref, b0_ref, w1_ref, b1_ref, w2_ref,
                              b2_ref, out_ref, emb_ref):
    out, emb = _forward_body(x_ref, w0_ref, b0_ref, w1_ref, b1_ref, w2_ref, b2_ref)
    out_ref[...] = out.astype(out_ref.dtype)
    emb_ref[...] = emb.astype(emb_ref.dtype)


# ---------------------------------------------------------------------------
# Parameter preparation (one-time: transpose, pad N to 128 lanes, cast)
# ---------------------------------------------------------------------------
def prepare_params(params, compute_dtype=jnp.bfloat16):
    """Torch-layout params -> kernel-layout params (done ONCE, not per call).

    Zero-padding of output/hidden feature dims is exact for Linear+ReLU stacks
    (padded weight columns and bias entries are zero; ReLU(0)=0).  The first
    layer's K dim (in_dim) is deliberately NOT padded so the streamed x stays
    narrow."""

    def prep_w_first(w):  # torch (out, in) -> (in, out_pad)
        o, _ = w.shape
        op = _round_up(o, 128)
        wt = jnp.asarray(w, jnp.float32).T
        wt = jnp.pad(wt, ((0, 0), (0, op - o)))
        return wt.astype(compute_dtype)

    def prep_w(w):        # torch (out, in) -> (in_pad, out_pad)
        o, i = w.shape
        ip, op = _round_up(i, 128), _round_up(o, 128)
        wt = jnp.asarray(w, jnp.float32).T
        wt = jnp.pad(wt, ((0, ip - i), (0, op - o)))
        return wt.astype(compute_dtype)

    def prep_b(b):        # (out,) -> f32 (1, out_pad); bias add stays f32
        o = b.shape[0]
        op = _round_up(o, 128)
        bp = jnp.pad(jnp.asarray(b, jnp.float32), (0, op - o))
        return bp[None, :]

    return {
        "w0": prep_w_first(params["w_pre"]), "b0": prep_b(params["b_pre"]),
        "w1": prep_w(params["w_add"]),       "b1": prep_b(params["b_add"]),
        "w2": prep_w(params["w_fin"]),       "b2": prep_b(params["b_fin"]),
        "dims": (params["w_pre"].shape[1], params["w_pre"].shape[0],
                 params["w_add"].shape[0], params["w_fin"].shape[0]),
        "compute_dtype": jnp.dtype(compute_dtype),
    }


# ---------------------------------------------------------------------------
# Forward wrapper
# ---------------------------------------------------------------------------
def finetune_forward(x, prepared, get_embeddings_additional_layer=False):
    """Fused FineTuneModel forward pass. x: [B, in_dim] (f32 or compute dtype)."""
    in_dim, hidden, embed, out_dim = prepared["dims"]
    cdt = prepared["compute_dtype"]

    w0, b0 = prepared["w0"], prepared["b0"]
    w1, b1 = prepared["w1"], prepared["b1"]
    w2, b2 = prepared["w2"], prepared["b2"]
    hid_pad = w0.shape[1]
    emb_pad = w1.shape[1]
    out_pad = w2.shape[1]
    out_dtype = cdt  # f32 accumulation inside; cast on store, cast back outside if needed

    B = x.shape[0]
    min_mult = 16 if jnp.dtype(out_dtype).itemsize < 4 else 8
    tile_b = _choose_tile_b(B, min_mult)
    b_pad = _round_up(B, tile_b)
    nb = b_pad // tile_b

    # No wrapper-side dtype cast or K-padding of x; pad the batch dim only when
    # the tile does not divide it.
    x_in = x if b_pad == B else jnp.pad(x, ((0, b_pad - B), (0, 0)))

    single_buf = _single_buffer_resident_supported()

    def resident(arr):
        # Constant index_map -> VMEM-resident across the batch loop; single
        # buffered when supported (constant blocks never change).
        if single_buf:
            return pl.BlockSpec(arr.shape, lambda i: (0, 0),
                                pipeline_mode=pl.Buffered(1))
        return pl.BlockSpec(arr.shape, lambda i: (0, 0))

    in_specs = [
        pl.BlockSpec((tile_b, in_dim), lambda i: (i, 0)),   # streamed activations
        resident(w0), resident(b0),
        resident(w1), resident(b1),
        resident(w2), resident(b2),
    ]
    out_spec = pl.BlockSpec((tile_b, out_pad), lambda i: (i, 0))
    emb_spec = pl.BlockSpec((tile_b, emb_pad), lambda i: (i, 0))

    # VMEM budget: resident params (x buffer count) + double-buffered streams
    # + f32 intermediates, with headroom, so the scoped-VMEM default
    # (16/32 MiB) is never the binding constraint as tiles/weights grow.
    out_isz = jnp.dtype(out_dtype).itemsize
    x_isz = jnp.dtype(x_in.dtype).itemsize
    res_bytes = sum(int(a.size) * a.dtype.itemsize
                    for a in (w0, b0, w1, b1, w2, b2))
    res_bufs = 1 if single_buf else 2
    stream_bytes = tile_b * (in_dim * x_isz + out_pad * out_isz)
    if get_embeddings_additional_layer:
        stream_bytes += tile_b * emb_pad * out_isz
    interm_bytes = tile_b * (hid_pad + emb_pad + out_pad) * 4
    need = res_bytes * res_bufs + 2 * stream_bytes + interm_bytes
    vmem_limit = int(min(max(need + need // 4 + (2 << 20), 32 << 20), 96 << 20))

    flops = 2 * b_pad * (in_dim * hid_pad + hid_pad * emb_pad + emb_pad * out_pad)
    hbm_bytes = res_bytes + b_pad * in_dim * x_isz + b_pad * out_pad * out_isz
    if get_embeddings_additional_layer:
        hbm_bytes += b_pad * emb_pad * out_isz
    cost = pl.CostEstimate(flops=flops, transcendentals=0,
                           bytes_accessed=hbm_bytes)

    compiler_params = pltpu.CompilerParams(
        dimension_semantics=("parallel",),
        vmem_limit_bytes=vmem_limit,
    )
    args = (x_in, w0, b0, w1, b1, w2, b2)

    if get_embeddings_additional_layer:
        out, emb = pl.pallas_call(
            _finetune_kernel_with_emb,
            out_shape=(jax.ShapeDtypeStruct((b_pad, out_pad), out_dtype),
                       jax.ShapeDtypeStruct((b_pad, emb_pad), out_dtype)),
            grid=(nb,),
            in_specs=in_specs,
            out_specs=(out_spec, emb_spec),
            compiler_params=compiler_params,
            cost_estimate=cost,
        )(*args)
        return out[:B, :out_dim], emb[:B, :embed]

    out = pl.pallas_call(
        _finetune_kernel,
        out_shape=jax.ShapeDtypeStruct((b_pad, out_pad), out_dtype),
        grid=(nb,),
        in_specs=in_specs,
        out_specs=out_spec,
        compiler_params=compiler_params,
        cost_estimate=cost,
    )(*args)
    return out[:B, :out_dim]


# ---------------------------------------------------------------------------
# Test harness
# ---------------------------------------------------------------------------
def _init_params(key, in_dim, hidden, embed, out_dim):
    ks = jax.random.split(key, 6)
    # Torch layout: weight (out_features, in_features), bias (out_features,)
    return {
        "w_pre": jax.random.normal(ks[0], (hidden, in_dim), jnp.float32) * 0.1,
        "b_pre": jax.random.normal(ks[1], (hidden,), jnp.float32) * 0.1,
        "w_add": jax.random.normal(ks[2], (embed, hidden), jnp.float32) * 0.1,
        "b_add": jax.random.normal(ks[3], (embed,), jnp.float32) * 0.1,
        "w_fin": jax.random.normal(ks[4], (out_dim, embed), jnp.float32) * 0.1,
        "b_fin": jax.random.normal(ks[5], (out_dim,), jnp.float32) * 0.1,
    }


def _reference(x, p):
    h = jnp.maximum(x @ p["w_pre"].T + p["b_pre"], 0.0)
    e = jnp.maximum(h @ p["w_add"].T + p["b_add"], 0.0)
    return e @ p["w_fin"].T + p["b_fin"], e


if __name__ == "__main__":
    B, IN_DIM, HIDDEN, EMBED, OUT_DIM = 2, 32, 64, 32, 8

    key = jax.random.PRNGKey(0)
    kx, kp, kx2 = jax.random.split(key, 3)
    x = jax.random.normal(kx, (B, IN_DIM), jnp.float32)
    params = _init_params(kp, IN_DIM, HIDDEN, EMBED, OUT_DIM)
    ref_out, ref_emb = _reference(x, params)

    # --- f32 path: exact semantics check -----------------------------------
    prep_f32 = prepare_params(params, compute_dtype=jnp.float32)
    out32, emb32 = finetune_forward(x, prep_f32,
                                    get_embeddings_additional_layer=True)
    out32 = jax.block_until_ready(out32)
    emb32 = jax.block_until_ready(emb32)
    assert out32.shape == (B, OUT_DIM) and emb32.shape == (B, EMBED)
    assert jnp.allclose(out32, ref_out, atol=1e-4, rtol=1e-4)
    assert jnp.allclose(emb32, ref_emb, atol=1e-4, rtol=1e-4)

    # --- bf16 operands / f32 accumulation path (default, MXU-rate friendly) -
    prep_bf16 = prepare_params(params, compute_dtype=jnp.bfloat16)
    out16, emb16 = finetune_forward(x, prep_bf16,
                                    get_embeddings_additional_layer=True)
    out16 = jax.block_until_ready(out16)
    emb16 = jax.block_until_ready(emb16)
    assert out16.shape == (B, OUT_DIM) and emb16.shape == (B, EMBED)
    assert jnp.allclose(out16.astype(jnp.float32), ref_out, atol=5e-2, rtol=5e-2)
    assert jnp.allclose(emb16.astype(jnp.float32), ref_emb, atol=5e-2, rtol=5e-2)

    # --- no-embedding variant: skips the [B, embed] HBM writeback -----------
    out_only = finetune_forward(x, prep_bf16,
                                get_embeddings_additional_layer=False)
    out_only = jax.block_until_ready(out_only)
    assert out_only.shape == (B, OUT_DIM)
    assert jnp.allclose(out_only.astype(jnp.float32), ref_out, atol=5e-2, rtol=5e-2)

    # --- multi-tile / batch-padding path (grid > 1), f32 exact --------------
    B2 = 600
    x2 = jax.random.normal(kx2, (B2, IN_DIM), jnp.float32)
    ref2, _ = _reference(x2, params)
    out2 = finetune_forward(x2, prep_f32, get_embeddings_additional_layer=False)
    out2 = jax.block_until_ready(out2)
    assert out2.shape == (B2, OUT_DIM)
    assert jnp.allclose(out2, ref2, atol=1e-4, rtol=1e-4)

    print("KERNEL_OK")
</pallas_src>

<mosaic_0001>
module attributes {stable_mosaic.version = 11 : i64} {
  func.func @k(%arg0: i32, %arg1: memref<8x128xf32, #tpu.memory_space<vmem>>, %arg2: memref<8x128xf32, #tpu.memory_space<vmem>>) attributes {dimension_semantics = [#tpu.dimension_semantics<arbitrary>], iteration_bounds = array<i64: 2>, scalar_prefetch = 0 : i64, scratch_operands = 0 : i64, tpu.core_type = #tpu.core_type<tc>, window_params = [{pipeline_mode = #tpu.pipeline_mode<synchronous>, transform_indices = @transform_0, window_bounds = array<i64: 8, 128>}, {pipeline_mode = #tpu.pipeline_mode<synchronous>, transform_indices = @transform_1, window_bounds = array<i64: 8, 128>}]} {
    %c0 = arith.constant 0 : index
    %c0_0 = arith.constant 0 : index
    %0 = vector.load %arg1[%c0, %c0_0] : memref<8x128xf32, #tpu.memory_space<vmem>>, vector<8x128xf32>
    %cst = arith.constant 1.000000e+00 : f32
    %1 = vector.broadcast %cst : f32 to vector<8x128xf32>
    %2 = arith.addf %0, %1 : vector<8x128xf32>
    %c0_1 = arith.constant 0 : index
    %c0_2 = arith.constant 0 : index
    %3 = vector.load %arg2[%c0_1, %c0_2] : memref<8x128xf32, #tpu.memory_space<vmem>>, vector<8x128xf32>
    tpu.vector_store %arg2[%c0_1, %c0_2], %2 {strides = array<i32>} : memref<8x128xf32, #tpu.memory_space<vmem>>, vector<8x128xf32>,
    return
  }
  func.func @transform_0(%arg0: i32) -> (i32, i32) {
    %c0_i32 = arith.constant 0 : i32
    %c0_i32_0 = arith.constant 0 : i32
    %c0_i32_1 = arith.constant 0 : i32
    return %c0_i32, %c0_i32_0 : i32, i32
  }
  func.func @transform_1(%arg0: i32) -> (i32, i32) {
    %c0_i32 = arith.constant 0 : i32
    %c0_i32_0 = arith.constant 0 : i32
    %c0_i32_1 = arith.constant 0 : i32
    return %c0_i32, %c0_i32_0 : i32, i32
  }
}

module attributes {stable_mosaic.version = 11 : i64} {
  func.func @_finetune_kernel_with_emb(%arg0: i32, %arg1: memref<8x32xf32, #tpu.memory_space<vmem>>, %arg2: memref<32x128xf32, #tpu.memory_space<vmem>>, %arg3: memref<1x128xf32, #tpu.memory_space<vmem>>, %arg4: memref<128x128xf32, #tpu.memory_space<vmem>>, %arg5: memref<1x128xf32, #tpu.memory_space<vmem>>, %arg6: memref<128x128xf32, #tpu.memory_space<vmem>>, %arg7: memref<1x128xf32, #tpu.memory_space<vmem>>, %arg8: memref<8x128xf32, #tpu.memory_space<vmem>>, %arg9: memref<8x128xf32, #tpu.memory_space<vmem>>) attributes {dimension_semantics = [#tpu.dimension_semantics<parallel>], iteration_bounds = array<i64: 1>, scalar_prefetch = 0 : i64, scratch_operands = 0 : i64, tpu.core_type = #tpu.core_type<tc>, window_params = [{transform_indices = @transform_0, window_bounds = array<i64: 8, 32>}, {pipeline_mode = #tpu.pipeline_mode<synchronous>, transform_indices = @transform_1, window_bounds = array<i64: 32, 128>}, {pipeline_mode = #tpu.pipeline_mode<synchronous>, transform_indices = @transform_2, window_bounds = array<i64: 1, 128>}, {pipeline_mode = #tpu.pipeline_mode<synchronous>, transform_indices = @transform_3, window_bounds = array<i64: 128, 128>}, {pipeline_mode = #tpu.pipeline_mode<synchronous>, transform_indices = @transform_4, window_bounds = array<i64: 1, 128>}, {pipeline_mode = #tpu.pipeline_mode<synchronous>, transform_indices = @transform_5, window_bounds = array<i64: 128, 128>}, {pipeline_mode = #tpu.pipeline_mode<synchronous>, transform_indices = @transform_6, window_bounds = array<i64: 1, 128>}, {transform_indices = @transform_7, window_bounds = array<i64: 8, 128>}, {transform_indices = @transform_8, window_bounds = array<i64: 8, 128>}]} {
    %c0 = arith.constant 0 : index
    %c0_0 = arith.constant 0 : index
    %0 = vector.load %arg1[%c0, %c0_0] : memref<8x32xf32, #tpu.memory_space<vmem>>, vector<8x32xf32>
    %c0_1 = arith.constant 0 : index
    %c0_2 = arith.constant 0 : index
    %1 = vector.load %arg2[%c0_1, %c0_2] : memref<32x128xf32, #tpu.memory_space<vmem>>, vector<32x128xf32>
    %cst = arith.constant dense<0.000000e+00> : vector<8x128xf32>
    %2 = tpu.matmul %0, %1, %cst {dimension_numbers = #tpu.dot_dimension_numbers<[1], [0], [0], [1], [0, 0, 1, 1], [], []>} : vector<8x32xf32>, vector<32x128xf32>, vector<8x128xf32> -> vector<8x128xf32>
    %c0_3 = arith.constant 0 : index
    %c0_4 = arith.constant 0 : index
    %3 = vector.load %arg3[%c0_3, %c0_4] : memref<1x128xf32, #tpu.memory_space<vmem>>, vector<1x128xf32>
    %4 = vector.broadcast %3 : vector<1x128xf32> to vector<8x128xf32>
    %5 = arith.addf %2, %4 : vector<8x128xf32>
    %cst_5 = arith.constant 0.000000e+00 : f32
    %6 = vector.broadcast %cst_5 : f32 to vector<8x128xf32>
    %7 = arith.maximumf %5, %6 : vector<8x128xf32>
    %c0_6 = arith.constant 0 : index
    %c0_7 = arith.constant 0 : index
    %8 = vector.load %arg4[%c0_6, %c0_7] : memref<128x128xf32, #tpu.memory_space<vmem>>, vector<128x128xf32>
    %cst_8 = arith.constant dense<0.000000e+00> : vector<8x128xf32>
    %9 = tpu.matmul %7, %8, %cst_8 {dimension_numbers = #tpu.dot_dimension_numbers<[1], [0], [0], [1], [0, 0, 1, 1], [], []>} : vector<8x128xf32>, vector<128x128xf32>, vector<8x128xf32> -> vector<8x128xf32>
    %c0_9 = arith.constant 0 : index
    %c0_10 = arith.constant 0 : index
    %10 = vector.load %arg5[%c0_9, %c0_10] : memref<1x128xf32, #tpu.memory_space<vmem>>, vector<1x128xf32>
    %11 = vector.broadcast %10 : vector<1x128xf32> to vector<8x128xf32>
    %12 = arith.addf %9, %11 : vector<8x128xf32>
    %cst_11 = arith.constant 0.000000e+00 : f32
    %13 = vector.broadcast %cst_11 : f32 to vector<8x128xf32>
    %14 = arith.maximumf %12, %13 : vector<8x128xf32>
    %c0_12 = arith.constant 0 : index
    %c0_13 = arith.constant 0 : index
    %15 = vector.load %arg6[%c0_12, %c0_13] : memref<128x128xf32, #tpu.memory_space<vmem>>, vector<128x128xf32>
    %cst_14 = arith.constant dense<0.000000e+00> : vector<8x128xf32>
    %16 = tpu.matmul %14, %15, %cst_14 {dimension_numbers = #tpu.dot_dimension_numbers<[1], [0], [0], [1], [0, 0, 1, 1], [], []>} : vector<8x128xf32>, vector<128x128xf32>, vector<8x128xf32> -> vector<8x128xf32>
    %c0_15 = arith.constant 0 : index
    %c0_16 = arith.constant 0 : index
    %17 = vector.load %arg7[%c0_15, %c0_16] : memref<1x128xf32, #tpu.memory_space<vmem>>, vector<1x128xf32>
    %18 = vector.broadcast %17 : vector<1x128xf32> to vector<8x128xf32>
    %19 = arith.addf %16, %18 : vector<8x128xf32>
    %c0_17 = arith.constant 0 : index
    %c0_18 = arith.constant 0 : index
    %20 = vector.load %arg8[%c0_17, %c0_18] : memref<8x128xf32, #tpu.memory_space<vmem>>, vector<8x128xf32>
    tpu.vector_store %arg8[%c0_17, %c0_18], %19 {strides = array<i32>} : memref<8x128xf32, #tpu.memory_space<vmem>>, vector<8x128xf32>,
    %c0_19 = arith.constant 0 : index
    %c0_20 = arith.constant 0 : index
    %21 = vector.load %arg9[%c0_19, %c0_20] : memref<8x128xf32, #tpu.memory_space<vmem>>, vector<8x128xf32>
    tpu.vector_store %arg9[%c0_19, %c0_20], %14 {strides = array<i32>} : memref<8x128xf32, #tpu.memory_space<vmem>>, vector<8x128xf32>,
    return
  }
  func.func @transform_0(%arg0: i32) -> (i32, i32) {
    %c0_i32 = arith.constant 0 : i32
    %c0_i32_0 = arith.constant 0 : i32
    return %arg0, %c0_i32 : i32, i32
  }
  func.func @transform_1(%arg0: i32) -> (i32, i32) {
    %c0_i32 = arith.constant 0 : i32
    %c0_i32_0 = arith.constant 0 : i32
    %c0_i32_1 = arith.constant 0 : i32
    return %c0_i32, %c0_i32_0 : i32, i32
  }
  func.func @transform_2(%arg0: i32) -> (i32, i32) {
    %c0_i32 = arith.constant 0 : i32
    %c0_i32_0 = arith.constant 0 : i32
    %c0_i32_1 = arith.constant 0 : i32
    return %c0_i32, %c0_i32_0 : i32, i32
  }
  func.func @transform_3(%arg0: i32) -> (i32, i32) {
    %c0_i32 = arith.constant 0 : i32
    %c0_i32_0 = arith.constant 0 : i32
    %c0_i32_1 = arith.constant 0 : i32
    return %c0_i32, %c0_i32_0 : i32, i32
  }
  func.func @transform_4(%arg0: i32) -> (i32, i32) {
    %c0_i32 = arith.constant 0 : i32
    %c0_i32_0 = arith.constant 0 : i32
    %c0_i32_1 = arith.constant 0 : i32
    return %c0_i32, %c0_i32_0 : i32, i32
  }
  func.func @transform_5(%arg0: i32) -> (i32, i32) {
    %c0_i32 = arith.constant 0 : i32
    %c0_i32_0 = arith.constant 0 : i32
    %c0_i32_1 = arith.constant 0 : i32
    return %c0_i32, %c0_i32_0 : i32, i32
  }
  func.func @transform_6(%arg0: i32) -> (i32, i32) {
    %c0_i32 = arith.constant 0 : i32
    %c0_i32_0 = arith.constant 0 : i32
    %c0_i32_1 = arith.constant 0 : i32
    return %c0_i32, %c0_i32_0 : i32, i32
  }
  func.func @transform_7(%arg0: i32) -> (i32, i32) {
    %c0_i32 = arith.constant 0 : i32
    %c0_i32_0 = arith.constant 0 : i32
    return %arg0, %c0_i32 : i32, i32
  }
  func.func @transform_8(%arg0: i32) -> (i32, i32) {
    %c0_i32 = arith.constant 0 : i32
    %c0_i32_0 = arith.constant 0 : i32
    return %arg0, %c0_i32 : i32, i32
  }
}

</mosaic_0001>

<bundles_post_ra>
// kernel: tpu_custom_call.1
= control target key start
LH: loop header
LB: loop body
LE: loop exit
PB: predicated region body
PF: predicated region fallthrough
CT: control target
= control target key end

     0   :  { %6 = vsyncpa [#allocation3], 0  ;;  %s341_s0 = inlined_call_operand.hbm [shape: f32[8,128], index: 0, kind: input, shape index: {}]   ;;  %s342_s1 = inlined_call_operand.hbm [shape: f32[8,128], index: 1, kind: output, shape index: {}]  }
   0x1   :  { %7 = vsyncpa [#allocation4], 0  ;;  %s262_s6 = smov 0  }
   0x2 LB: > { %s145_s7 = sadd.s32 4294967295, %s248_s6   ;;  %p146_p0 = scmp.ge.s32.totalorder %s248_s6, 1  ;;  %s248_s6 = sphi %s262_s6, %s13_s6  }
   0x3   : > { %p60_p1 = scmp.lt.s32.totalorder %s248_s6, 3  ;;  %p276_p3 = scmp.eq.s32.totalorder %s145_s7, 0 }
   0x4   : > { %s250_s10 = smov [#allocation2]   ;;  %s180_s15 = scalar_lea.hbm %s341_s0, 128 }
   0x5   : > { %p270_p2 = pnand %p146_p0, %p60_p1  ;;  %s73_s11 = sshll.u32 %s250_s10, 4  ;;  %s74_s11 = int_to_ptr.vmem [resolvable:$true] %s73_s11 }
   0x6   : > { %s347_s9 = scalar_select %p276_p3, 1, 0 }
   0x7   : > { %s346_s8 = scalar_select %p270_p2, 1, 0 }
   0x8   : > { %p162_p4 = pneg %p270_p2  ;;  %p181_p6 = scmp.ne.s32.totalorder %s341_s0, %s180_s15 }
   0x9   : > { %p187_p10 = scmp.lt.u32.totalorder %s180_s15, %s341_s0 }
   0xa   : > { %p284_p5 = pnand %p276_p3, %p162_p4 }
   0xc   : > { %p182_p7 = pneg %p284_p5 }
   0xe   : > { %p183_p8 = pnand %p182_p7, %p181_p6 }
  0x10   : > { %p184_p9 = pneg %p183_p8 }
  0x12   : > { %p189_p11 = pnand %p187_p10, %p184_p9 }
  0x14   : > { %192 = shalt.err (!%p189_p11)
}
  0x15   : > { %s193_s20 = scalar_lea.vmem %s74_s11, 128  ;;  %p201_p1 = scmp.lt.s32.totalorder %s74_s11, %s74_s11 }
  0x16   : > { %p194_p12 = scmp.ne.s32.totalorder %s74_s11, %s193_s20  ;;  %p202_p4 = scmp.lt.s32.totalorder %s193_s20, %s193_s20 }
  0x18   : > { %p196_p13 = pnand %p194_p12, %p182_p7  ;;  %p203_p3 = por %p202_p4, %p201_p1 }
  0x1a   : > { %p197_p0 = pneg %p196_p13 }
  0x1c   : > { %p204_p2 = pnand %p203_p3, %p197_p0 }
  0x1e   : > { %207 = shalt.err (!%p204_p2)
}
  0x1f   : > { %165 = dma.hbm_to_vmem [thread:$0]  (!%p284_p5), %s341_s0, 128, %s74_s11, [#allocation3]  }
  0x20   : > { %p349_p6 = scmp.ne.s32.totalorder %s346_s8, 0 }
  0x21   : > { %p350_p8 = scmp.ne.s32.totalorder (!%p349_p6), %s347_s9, 0 }
  0x22   : > { %86 = sbr.rel (%p349_p6) target bundleno = 67 (0x43), region = 24 }
  0x29   : > { %239 = dma.done.wait (%p350_p8), [#allocation3], 128  }
  0x2a   : > { %241 = vsyncadd (%p350_p8), [#allocation3], 4294967168  ;;  %s251_s23 = smov [#allocation5]   ;;  %v96_v0 = vld [vmem:[#allocation2] sm:$0xff]  ;;  %p312_p2 = scmp.eq.s32.totalorder %s145_s7, 1 }
  0x2b   : > { %s106_s24 = sshll.u32 %s251_s23, 4  ;;  %v97_v1 = vadd.f32 1.0, %v96_v0  ;;  %s107_s24 = int_to_ptr.vmem [resolvable:$true] %s106_s24 }
  0x2c   : > { %s208_s26 = scalar_lea.vmem %s107_s24, 128  ;;  %p215_p9 = scmp.lt.s32.totalorder %s107_s24, %s107_s24 }
  0x2d   : > { %98 = vst [vmem:[#allocation5] sm:$0xff] %v97_v1  ;;  %p209_p3 = scmp.ne.s32.totalorder %s107_s24, %s208_s26  ;;  %p216_p10 = scmp.lt.s32.totalorder %s208_s26, %s208_s26 }
  0x2f   : > { %p210_p5 = pnand %p209_p3, %p312_p2  ;;  %p217_p11 = por %p216_p10, %p215_p9 }
  0x31   : > { %p211_p7 = pneg %p210_p5 }
  0x33   : > { %p218_p12 = pnand %p217_p11, %p211_p7 }
  0x35   : > { %221 = shalt.err (!%p218_p12)
}
  0x36   : > { %s222_s29 = scalar_lea.hbm %s342_s1, 128 }
  0x37   : > { %p223_p13 = scmp.ne.s32.totalorder %s342_s1, %s222_s29  ;;  %p228_p4 = scmp.lt.u32.totalorder %s222_s29, %s342_s1 }
  0x39   : > { %p224_p0 = pnand %p223_p13, %p312_p2 }
  0x3b   : > { %p225_p1 = pneg %p224_p0 }
  0x3d   : > { %p230_p6 = pnand %p228_p4, %p225_p1 }
  0x3f   : > { %233 = shalt.err (!%p230_p6)
}
  0x40   : > { %159 = dma.vmem_to_hbm [thread:$0]  (%p312_p2), %s107_s24, 128, %s342_s1, [#allocation4]  }
  0x41   : > { %243 = dma.done.wait (%p312_p2), [#allocation4], 128  }
  0x42   : > { %245 = vsyncadd (%p312_p2), [#allocation4], 4294967168 }
  0x43 PF: > { %s13_s6 = sadd.s32 1, %s248_s6  }
  0x44   : > { %p10_p8 = scmp.ge.s32.totalorder %s13_s6, 4  }
  0x46   :  { %12 = sbr.rel (!%p10_p8) target bundleno = 2 (0x2), region = 53 }
  0x4d   :  { %119 = vsyncpa [#allocation3], 1 }
  0x4e   :  { %121 = vsyncpa [#allocation3 + $0x1], 1 }
  0x4f   :  { %122 = vsyncpa [#allocation4], 1 }
  0x50   :  { %124 = vsyncpa [#allocation4 + $0x1], 1 }

// kernel: tpu_custom_call.1
= control target key start
LH: loop header
LB: loop body
LE: loop exit
PB: predicated region body
PF: predicated region fallthrough
CT: control target
= control target key end

     0   :  { %14 = vsyncpa [#allocation3], 0  ;;  %s888_s0 = inlined_call_operand.hbm [shape: f32[8,32], index: 0, kind: input, shape index: {}]   ;;  %s889_s1 = inlined_call_operand.hbm [shape: f32[32,128], index: 1, kind: input, shape index: {}]   ;;  %s890_s2 = inlined_call_operand.vmem [shape: f32[1,128], index: 2, kind: input, shape index: {}]   ;;  %s891_s3 = inlined_call_operand.hbm [shape: f32[128,128], index: 3, kind: input, shape index: {}]   ;;  %s892_s4 = inlined_call_operand.vmem [shape: f32[1,128], index: 4, kind: input, shape index: {}]   ;;  %s893_s5 = inlined_call_operand.hbm [shape: f32[128,128], index: 5, kind: input, shape index: {}]   ;;  %s894_s6 = inlined_call_operand.vmem [shape: f32[1,128], index: 6, kind: input, shape index: {}]   ;;  %s895_s7 = inlined_call_operand.hbm [shape: f32[8,128], index: 7, kind: output, shape index: {0}]   ;;  %s896_s8 = inlined_call_operand.hbm [shape: f32[8,128], index: 8, kind: output, shape index: {1}]  }
   0x1   :  { %15 = vsyncpa [#allocation6], 0 }
   0x2   :  { %16 = vsyncpa [#allocation9], 0 }
   0x3   :  { %17 = vsyncpa [#allocation4], 0 }
   0x4   :  { %18 = vsyncpa [#allocation12], 0  ;;  %s721_s27 = smov [#allocation5]   ;;  %s579_s9 = scalar_lea.hbm %s889_s1, 512 }
   0x5   :  { %s34_s28 = sshll.u32 %s721_s27, 4  ;;  %p580_p0 = scmp.ne.s32.totalorder %s889_s1, %s579_s9  ;;  %s35_s28 = int_to_ptr.vmem [resolvable:$true] %s34_s28 }
   0x6   :  { %p583_p1 = scmp.lt.u32.totalorder %s579_s9, %s889_s1 }
   0x8   :  { %p585_p2 = pnand %p583_p1, %p580_p0 }
   0xa   :  { %588 = shalt.err (!%p585_p2)
}
   0xb   :  { %s589_s14 = scalar_lea.vmem %s35_s28, 512  ;;  %p594_p4 = scmp.lt.s32.totalorder %s35_s28, %s35_s28 }
   0xc   :  { %p590_p3 = scmp.ne.s32.totalorder %s35_s28, %s589_s14  ;;  %p595_p5 = scmp.lt.s32.totalorder %s589_s14, %s589_s14 }
   0xe   :  { %p596_p6 = por %p595_p5, %p594_p4 }
  0x10   :  { %p597_p7 = pnand %p596_p6, %p590_p3 }
  0x12   :  { %600 = shalt.err (!%p597_p7)
}
  0x13   :  { %s722_s15 = smov 128   ;;  %s723_s16 = smov 8  }
  0x14   :  { %40 = dma.hbm_to_vmem [thread:$0]  %s889_s1, 512, %s35_s28, [#allocation6], %s722_s15, %s722_s15, %s723_s16  }
  0x15   :  { %s724_s19 = smov [#allocation2]   ;;  %s725_s21 = smov [#allocation7]  }
  0x16   :  { %s25_s20 = sshll.u32 %s724_s19, 4  ;;  %s48_s22 = sshll.u32 %s725_s21, 4  ;;  %s26_s20 = int_to_ptr.vmem [resolvable:$true] %s25_s20  ;;  %s49_s22 = int_to_ptr.vmem [resolvable:$true] %s48_s22 }
  0x17   :  { %s601_s25 = scalar_lea.hbm %s888_s0, 128 }
  0x18   :  { %p602_p8 = scmp.ne.s32.totalorder %s888_s0, %s601_s25  ;;  %p605_p9 = scmp.lt.u32.totalorder %s601_s25, %s888_s0 }
  0x1a   :  { %p607_p10 = pnand %p605_p9, %p602_p8 }
  0x1c   :  { %610 = shalt.err (!%p607_p10)
}
  0x1d   :  { %s611_s1 = scalar_lea.vmem %s26_s20, 128  ;;  %p616_p12 = scmp.lt.s32.totalorder %s26_s20, %s26_s20 }
  0x1e   :  { %p612_p11 = scmp.ne.s32.totalorder %s26_s20, %s611_s1  ;;  %p617_p13 = scmp.lt.s32.totalorder %s611_s1, %s611_s1 }
  0x20   :  { %p618_p0 = por %p617_p13, %p616_p12 }
  0x22   :  { %p619_p1 = pnand %p618_p0, %p612_p11 }
  0x24   :  { %622 = shalt.err (!%p619_p1)
}
  0x25   :  { %28 = dma.hbm_to_vmem [thread:$0]  %s888_s0, 128, %s26_s20, [#allocation3]  }
  0x26   :  { %s623_s12 = scalar_lea.hbm %s891_s3, 2048 }
  0x27   :  { %p624_p2 = scmp.ne.s32.totalorder %s891_s3, %s623_s12  ;;  %p627_p3 = scmp.lt.u32.totalorder %s623_s12, %s891_s3 }
  0x29   :  { %p629_p4 = pnand %p627_p3, %p624_p2 }
  0x2b   :  { %632 = shalt.err (!%p629_p4)
}
  0x2c   :  { %s633_s19 = scalar_lea.vmem %s49_s22, 2048  ;;  %p638_p6 = scmp.lt.s32.totalorder %s49_s22, %s49_s22 }
  0x2d   :  { %p634_p5 = scmp.ne.s32.totalorder %s49_s22, %s633_s19  ;;  %p639_p7 = scmp.lt.s32.totalorder %s633_s19, %s633_s19 }
  0x2f   :  { %p640_p8 = por %p639_p7, %p638_p6 }
  0x31   :  { %p641_p9 = pnand %p640_p8, %p634_p5 }
  0x33   :  { %644 = shalt.err (!%p641_p9)
}
  0x34   :  { %54 = dma.hbm_to_vmem [thread:$0]  %s891_s3, 2048, %s49_s22, [#allocation6], %s722_s15, %s722_s15, %s723_s16  }
  0x35   :  { %s726_s21 = smov [#allocation8]   ;;  %s645_s26 = scalar_lea.hbm %s893_s5, 2048 }
  0x36   :  { %s62_s23 = sshll.u32 %s726_s21, 4  ;;  %p646_p10 = scmp.ne.s32.totalorder %s893_s5, %s645_s26  ;;  %s63_s23 = int_to_ptr.vmem [resolvable:$true] %s62_s23 }
  0x37   :  { %p649_p11 = scmp.lt.u32.totalorder %s645_s26, %s893_s5 }
  0x39   :  { %p651_p12 = pnand %p649_p11, %p646_p10 }
  0x3b   :  { %654 = shalt.err (!%p651_p12)
}
  0x3c   :  { %s655_s28 = scalar_lea.vmem %s63_s23, 2048  ;;  %p660_p0 = scmp.lt.s32.totalorder %s63_s23, %s63_s23 }
  0x3d   :  { %p656_p13 = scmp.ne.s32.totalorder %s63_s23, %s655_s28  ;;  %p661_p1 = scmp.lt.s32.totalorder %s655_s28, %s655_s28 }
  0x3f   :  { %p662_p2 = por %p661_p1, %p660_p0 }
  0x41   :  { %p663_p3 = pnand %p662_p2, %p656_p13 }
  0x43   :  { %666 = shalt.err (!%p663_p3)
}
  0x44   :  { %68 = dma.hbm_to_vmem [thread:$0]  %s893_s5, 2048, %s63_s23, [#allocation9], %s722_s15, %s722_s15, %s723_s16  }
  0x45   :  { %711 = dma.done.wait [#allocation3], 128  }
  0x46   :  { %712 = vsyncadd [#allocation3], 4294967168 }
  0x47   :  { %713 = dma.done.wait [#allocation6], 2560  }
  0x48   :  { %714 = vsyncadd [#allocation6], 4294964736 }
  0x49   :  { %715 = dma.done.wait [#allocation9], 2048  }
  0x4a   :  { %716 = vsyncadd [#allocation9], 4294965248  ;;  %v727_v0 = vmov 0.0|0.0   ;;  %vm728_vm0 = vmmov 0   ;;  %v729_v1 = vmov 0.0   ;;  %v84_v2 = vld [vmem:[#allocation5] sm:$0xff] }
  0x4b   :  { %514 = vmatprep.subr.bf16.mxu0 %v727_v0  ;;  %441 = vmatprep.mubr.msk.f32.mxu0 %vm728_vm0, %v729_v1  ;;  %v85_v3 = vld [vmem:[#allocation5 + $0x8] sm:$0xff]  ;;  %v86_v4 = vld [vmem:[#allocation5 + $0x10] sm:$0xff]  ;;  %v87_v6 = vld [vmem:[#allocation5 + $0x18] sm:$0xff]  ;;  %vm95_vm1 = vcmask 261120  }
  0x4c   :  { %520 = vmatprep.subr.bf16.mxu1 %v727_v0  ;;  %476 = vmatprep.mubr.msk.f32.mxu1 %vm728_vm0, %v729_v1  ;;  %v515_v5 = vpack.c.bf16 %v85_v3, %v84_v2  ;;  %v170_v7 = vld [vmem:[#allocation7] sm:$0xff]  ;;  %v171_v8 = vld [vmem:[#allocation7 + $0x8] sm:$0xff]  ;;  %v172_v9 = vld [vmem:[#allocation7 + $0x10] sm:$0xff]  ;;  %v518_v11 = vpack.c.bf16 %v87_v6, %v86_v4 }
  0x4d   :  { %v173_v10 = vld [vmem:[#allocation7 + $0x18] sm:$0xff]  ;;  %v521_v12 = vpack.c.bf16 %v171_v8, %v170_v7  ;;  %v174_v14 = vld [vmem:[#allocation7 + $0x20] sm:$0xff]  ;;  %v175_v15 = vld [vmem:[#allocation7 + $0x28] sm:$0xff] }
  0x4e   :  { %516 = vmatpush3.bf16.msra.mxu0 %v515_v5  ;;  %v524_v13 = vpack.c.bf16 %v173_v10, %v172_v9  ;;  %v83_v16 = vld [vmem:[#allocation2] sm:$0xff]  ;;  %v527_v17 = vpack.c.bf16 %v175_v15, %v174_v14  ;;  %v176_v18 = vld [vmem:[#allocation7 + $0x30] sm:$0xff]  ;;  %v178_v21 = vld [vmem:[#allocation7 + $0x40] sm:$0xff] }
  0x4f   :  { %517 = vmatprep.subr.bf16.mxu0 %v727_v0  ;;  %522 = vmatpush3.bf16.msra.mxu1 %v521_v12  ;;  %v177_v19 = vld [vmem:[#allocation7 + $0x38] sm:$0xff]  ;;  %v179_v22 = vld [vmem:[#allocation7 + $0x48] sm:$0xff]  ;;  %v180_v24 = vld [vmem:[#allocation7 + $0x50] sm:$0xff] }
  0x50   :  { %523 = vmatprep.subr.bf16.mxu1 %v727_v0  ;;  %v530_v20 = vpack.c.bf16 %v177_v19, %v176_v18  ;;  %v533_v23 = vpack.c.bf16 %v179_v22, %v178_v21  ;;  %v181_v25 = vld [vmem:[#allocation7 + $0x58] sm:$0xff]  ;;  %v182_v27 = vld [vmem:[#allocation7 + $0x60] sm:$0xff]  ;;  %v183_v28 = vld [vmem:[#allocation7 + $0x68] sm:$0xff] }
  0x51   :  { %v536_v26 = vpack.c.bf16 %v181_v25, %v180_v24  ;;  %v539_v29 = vpack.c.bf16 %v183_v28, %v182_v27  ;;  %v184_v30 = vld [vmem:[#allocation7 + $0x70] sm:$0xff]  ;;  %v185_v31 = vld [vmem:[#allocation7 + $0x78] sm:$0xff]  ;;  %v264_v33 = vld [vmem:[#allocation8] sm:$0xff] }
  0x52   :  { %519 = vmatpush3.bf16.msra.mxu0 %v518_v11  ;;  %v542_v32 = vpack.c.bf16 %v185_v31, %v184_v30  ;;  %v265_v34 = vld [vmem:[#allocation8 + $0x8] sm:$0xff]  ;;  %v266_v35 = vld [vmem:[#allocation8 + $0x10] sm:$0xff]  ;;  %v267_v37 = vld [vmem:[#allocation8 + $0x18] sm:$0xff] }
  0x53   :  { %544 = vmatprep.subr.bf16.mxu0 %v727_v0  ;;  %525 = vmatpush3.bf16.msra.mxu1 %v524_v13  ;;  %v545_v36 = vpack.c.bf16 %v265_v34, %v264_v33  ;;  %v548_v38 = vpack.c.bf16 %v267_v37, %v266_v35  ;;  %v268_v39 = vld [vmem:[#allocation8 + $0x20] sm:$0xff]  ;;  %v269_v40 = vld [vmem:[#allocation8 + $0x28] sm:$0xff]  ;;  %v270_v42 = vld [vmem:[#allocation8 + $0x30] sm:$0xff] }
  0x54   :  { %526 = vmatprep.subr.bf16.mxu1 %v727_v0  ;;  %v551_v41 = vpack.c.bf16 %v269_v40, %v268_v39  ;;  %v271_v43 = vld [vmem:[#allocation8 + $0x38] sm:$0xff]  ;;  %v272_v45 = vld [vmem:[#allocation8 + $0x40] sm:$0xff]  ;;  %v273_v46 = vld [vmem:[#allocation8 + $0x48] sm:$0xff] }
  0x55   :  { %442 = vmatmul.mubr.msk.f32.vlgmr.msra.gmra.mrb[0].mxu0 %vm95_vm1, %v83_v16  ;;  %v554_v44 = vpack.c.bf16 %v271_v43, %v270_v42  ;;  %v557_v47 = vpack.c.bf16 %v273_v46, %v272_v45  ;;  %v274_v48 = vld [vmem:[#allocation8 + $0x50] sm:$0xff]  ;;  %v275_v49 = vld [vmem:[#allocation8 + $0x58] sm:$0xff]  ;;  %v276_v51 = vld [vmem:[#allocation8 + $0x60] sm:$0xff] }
  0x56   :  { %511 = vmatprep.mubr.msk.f32.mxu0 %vm728_vm0, %v729_v1  ;;  %546 = vmatpush3.bf16.msra.mxu0 %v545_v36  ;;  %v560_v50 = vpack.c.bf16 %v275_v49, %v274_v48  ;;  %v277_v52 = vld [vmem:[#allocation8 + $0x68] sm:$0xff]  ;;  %v390_v54 = vld [vmem:[%s890_s2] ss:$0 sm:$0xff]  ;;  %v278_v59 = vld [vmem:[#allocation8 + $0x70] sm:$0xff]  ;;  %s730_s2 = smov [#allocation11]  }
  0x57   :  { %528 = vmatpush3.bf16.msra.mxu1 %v527_v17  ;;  %547 = vmatprep.subr.bf16.mxu0 %v727_v0  ;;  %v563_v53 = vpack.c.bf16 %v277_v52, %v276_v51  ;;  %v279_v60 = vld [vmem:[#allocation8 + $0x78] sm:$0xff]  ;;  %s375_s10 = sshll.u32 %s730_s2, 4  ;;  %s376_s10 = int_to_ptr.vmem [resolvable:$true] %s375_s10 }
  0x58   :  { %529 = vmatprep.subr.bf16.mxu1 %v727_v0  ;;  %v566_v61 = vpack.c.bf16 %v279_v60, %v278_v59  ;;  %v392_v62 = vld [vmem:[%s892_s4] ss:$0 sm:$0xff]  ;;  %s667_s11 = scalar_lea.vmem %s376_s10, 128  ;;  %p672_p5 = scmp.lt.s32.totalorder %s376_s10, %s376_s10 }
  0x59   :  { %p668_p4 = scmp.ne.s32.totalorder %s376_s10, %s667_s11  ;;  %p673_p6 = scmp.lt.s32.totalorder %s667_s11, %s667_s11 }
  0x5a   :  { %549 = vmatpush3.bf16.msra.mxu0 %v548_v38 }
  0x5b   :  { %531 = vmatpush3.bf16.msra.mxu1 %v530_v20  ;;  %550 = vmatprep.subr.bf16.mxu0 %v727_v0  ;;  %p674_p7 = por %p673_p6, %p672_p5 }
  0x5c   :  { %532 = vmatprep.subr.bf16.mxu1 %v727_v0 }
  0x5d   :  { %p675_p8 = pnand %p674_p7, %p668_p4 }
  0x5e   :  { %552 = vmatpush3.bf16.msra.mxu0 %v551_v41 }
  0x5f   :  { %534 = vmatpush3.bf16.msra.mxu1 %v533_v23  ;;  %553 = vmatprep.subr.bf16.mxu0 %v727_v0 }
  0x60   :  { %535 = vmatprep.subr.bf16.mxu1 %v727_v0 }
  0x62   :  { %555 = vmatpush3.bf16.msra.mxu0 %v554_v44 }
  0x63   :  { %537 = vmatpush3.bf16.msra.mxu1 %v536_v26  ;;  %556 = vmatprep.subr.bf16.mxu0 %v727_v0 }
  0x64   :  { %538 = vmatprep.subr.bf16.mxu1 %v727_v0 }
  0x66   :  { %558 = vmatpush3.bf16.msra.mxu0 %v557_v47 }
  0x67   :  { %540 = vmatpush3.bf16.msra.mxu1 %v539_v29  ;;  %559 = vmatprep.subr.bf16.mxu0 %v727_v0 }
  0x68   :  { %541 = vmatprep.subr.bf16.mxu1 %v727_v0 }
  0x6a   :  { %561 = vmatpush3.bf16.msra.mxu0 %v560_v50 }
  0x6b   :  { %543 = vmatpush3.bf16.msra.mxu1 %v542_v32  ;;  %562 = vmatprep.subr.bf16.mxu0 %v727_v0 }
  0x6e   :  { %564 = vmatpush3.bf16.msra.mxu0 %v563_v53 }
  0x6f   :  { %565 = vmatprep.subr.bf16.mxu0 %v727_v0 }
  0x72   :  { %567 = vmatpush3.bf16.msra.mxu0 %v566_v61 }
 0x128   :  { %v165_v55 = vpop.f32.mrb[0].mxu0 }
 0x129   :  { %v166_v56 = vadd.f32 %v390_v54, %v165_v55  ;;  %v443_v57 = vpop.f32.mrb[1].mxu0 }
 0x12b   :  { %v169_v58 = vmax.f32 %v166_v56, 0.0 }
 0x12d   :  { %477 = vmatmul.mubr.f32.vlgmr.msra.gmra.mrb[0].mxu1 %v169_v58 }
 0x200   :  { %v259_v63 = vpop.f32.mrb[0].mxu1 }
 0x201   :  { %v260_v1 = vadd.f32 %v392_v62, %v259_v63  ;;  %v478_v0 = vpop.f32.mrb[1].mxu1 }
 0x203   :  { %v263_v2 = vmax.f32 %v260_v1, 0.0 }
 0x205   :  { %358 = vst [vmem:[#allocation11] sm:$0xff] %v263_v2  ;;  %512 = vmatmul.mubr.f32.vlgmr.msra.gmra.mrb[2].mxu0 %v263_v2 }
 0x206   :  { %678 = shalt.err (!%p675_p8)
}
 0x207   :  { %s679_s4 = scalar_lea.hbm %s896_s8, 128 }
 0x208   :  { %p680_p9 = scmp.ne.s32.totalorder %s896_s8, %s679_s4  ;;  %p683_p10 = scmp.lt.u32.totalorder %s679_s4, %s896_s8 }
 0x20a   :  { %p685_p11 = pnand %p683_p10, %p680_p9 }
 0x20c   :  { %688 = shalt.err (!%p685_p11)
}
 0x20d   :  { %378 = dma.vmem_to_hbm [thread:$0]  %s376_s10, 128, %s896_s8, [#allocation12]   ;;  %v393_v3 = vld [vmem:[%s894_s6] ss:$0 sm:$0xff] }
 0x20e   :  { %s731_s24 = smov [#allocation10]  }
 0x20f   :  { %s365_s25 = sshll.u32 %s731_s24, 4  ;;  %s366_s25 = int_to_ptr.vmem [resolvable:$true] %s365_s25 }
 0x210   :  { %s689_s26 = scalar_lea.vmem %s366_s25, 128  ;;  %p694_p13 = scmp.lt.s32.totalorder %s366_s25, %s366_s25 }
 0x211   :  { %p690_p12 = scmp.ne.s32.totalorder %s366_s25, %s689_s26  ;;  %p695_p0 = scmp.lt.s32.totalorder %s689_s26, %s689_s26 }
 0x213   :  { %p696_p1 = por %p695_p0, %p694_p13 }
 0x215   :  { %p697_p2 = pnand %p696_p1, %p690_p12 }
 0x2d8   :  { %v353_v4 = vpop.f32.mrb[2].mxu0 }
 0x2d9   :  { %v354_v5 = vadd.f32 %v393_v3, %v353_v4  ;;  %v513_v6 = vpop.f32.mrb[3].mxu0 }
 0x2db   :  { %357 = vst [vmem:[#allocation10] sm:$0xff] %v354_v5 }
 0x2dc   :  { %700 = shalt.err (!%p697_p2)
}
 0x2dd   :  { %s701_s29 = scalar_lea.hbm %s895_s7, 128 }
 0x2de   :  { %p702_p3 = scmp.ne.s32.totalorder %s895_s7, %s701_s29  ;;  %p705_p4 = scmp.lt.u32.totalorder %s701_s29, %s895_s7 }
 0x2e0   :  { %p707_p5 = pnand %p705_p4, %p702_p3 }
 0x2e2   :  { %710 = shalt.err (!%p707_p5)
}
 0x2e3   :  { %368 = dma.vmem_to_hbm [thread:$0]  %s366_s25, 128, %s895_s7, [#allocation4]  }
 0x2e4   :  { %717 = dma.done.wait [#allocation4], 128  }
 0x2e5   :  { %718 = vsyncadd [#allocation4], 4294967168 }
 0x2e6   :  { %719 = dma.done.wait [#allocation12], 128  }
 0x2e7   :  { %720 = vsyncadd [#allocation12], 4294967168 }
 0x2e8   :  { %385 = vsyncpa [#allocation3], 1 }
 0x2e9   :  { %386 = vsyncpa [#allocation6], 1 }
 0x2ea   :  { %387 = vsyncpa [#allocation9], 1 }
 0x2eb   :  { %388 = vsyncpa [#allocation4], 1 }
 0x2ec   :  { %389 = vsyncpa [#allocation12], 1 }

</bundles_post_ra>
